<compile_context>
chip_gen: v7x
topology: tpu7x:2x2x1
jax: 0.10.0
libtpu: 0.0.40
codegen_flags: <defaults>
</compile_context>

<pallas_src>
import functools
import math

import jax
import jax.numpy as jnp
import numpy as np
from jax.experimental import pallas as pl
from jax.experimental.pallas import tpu as pltpu


def _round_up(v, m):
    return -(-v // m) * m


def _basic_block_kernel(x_ref, w1_ref, b1_ref, w2_ref, b2_ref, msk_ref, out_ref,
                        pad1_ref, pad2_ref, agg_ref, *, W, HW, S0, SLOT, Nb, NW):
    """Fused BasicBlock for Nb images, activations in lane-dense (C, lanes) layout.

    x_ref   : (Nb, C, HW)    input images, channels in sublanes, pixels in lanes.
    w*_ref  : (C, 9*C)       im2col conv weight (BN scale folded in).
    b*_ref  : (C, 1)         fused BN bias.
    msk_ref : (3, NW)        [dx=-1 validity, dx=+1 validity, real-pixel lanes].
    out_ref : (Nb, C, HW)
    pad*    : (C, NW+2*S0)   slot-layout activations with zero halos/gaps.
    agg     : (9*C, NW)      im2col aggregation buffer (matmul RHS).
    """
    C = x_ref.shape[1]
    Wtot = pad1_ref.shape[1]
    taps = [(dy, dx) for dy in (-1, 0, 1) for dx in (-1, 0, 1)]

    zero_halo = jnp.zeros((C, S0), jnp.float32)
    zero_gap = jnp.zeros((C, SLOT - HW), jnp.float32)

    # Stage the Nb images into their 128-aligned slots and (re)zero ONLY the halo /
    # inter-image gap lanes (not the whole scratch).  Every lane a tap can read is
    # rewritten each step, so no state is carried across grid iterations (safe when
    # the "parallel" batch axis is split across TensorCores).
    pad1_ref[:, 0:S0] = zero_halo
    pad1_ref[:, S0 + NW:Wtot] = zero_halo
    pad2_ref[:, 0:S0] = zero_halo
    pad2_ref[:, S0 + NW:Wtot] = zero_halo
    for b in range(Nb):
        base = b * SLOT + S0
        pad1_ref[:, base:base + HW] = x_ref[b].astype(jnp.float32)
        pad1_ref[:, base + HW:base + SLOT] = zero_gap

    m_neg = msk_ref[0:1, :]   # output columns where the dx = -1 taps are valid
    m_pos = msk_ref[1:2, :]   # output columns where the dx = +1 taps are valid
    m_val = msk_ref[2:3, :]   # lanes that hold real pixels (0 on halos / gaps)

    w1 = w1_ref[...].astype(jnp.float32)      # hoisted: loaded/cast once
    w2 = w2_ref[...].astype(jnp.float32)
    b1 = b1_ref[...].astype(jnp.float32)
    b2 = b2_ref[...].astype(jnp.float32)

    def conv3x3(pad_ref, w, b):
        # im2col: 9 masked, lane-shifted copies into the (9*C, NW) scratch, then a
        # SINGLE (C, 9*C) @ (9*C, NW) MXU matmul (instead of 9 tiny K=C matmuls).
        for t, (dy, dx) in enumerate(taps):
            start = S0 + dy * W + dx
            patch = pad_ref[:, start:start + NW]
            if dx == -1:                      # kill row wrap-around of the shift
                patch = patch * m_neg
            elif dx == 1:
                patch = patch * m_pos
            agg_ref[C * t:C * t + C, :] = patch
        # TODO(synk): on v6e/v7x the agg/weight MXU operands could be bf16; kept f32
        # here so the strict 1e-4 check against the f32 reference holds (and v5e
        # prefers f32 on the VPU side anyway).
        return jnp.dot(w, agg_ref[...], preferred_element_type=jnp.float32) + b

    # conv1 + bn1 + relu.  m_val zeroes the gap lanes so they act as conv2's halo;
    # the intermediate never leaves VMEM.
    out1 = jnp.maximum(conv3x3(pad1_ref, w1, b1), 0.0) * m_val
    pad2_ref[:, S0:S0 + NW] = out1
    # conv2 + bn2 + identity residual (x still sits in pad1 in slot layout).
    out2 = conv3x3(pad2_ref, w2, b2) + pad1_ref[:, S0:S0 + NW]

    for b in range(Nb):
        out_ref[b] = out2[:, b * SLOT:b * SLOT + HW].astype(out_ref.dtype)


def _fold_bn_into_weight(w_hwio, scale):
    """(3,3,Cin,Cout) conv weight + per-channel BN scale -> (Cout, 9*Cin) im2col weight."""
    k, _, cin, cout = w_hwio.shape
    w = w_hwio.reshape(k * k, cin, cout)                       # tap t = ky*3 + kx
    w = jnp.transpose(w, (0, 2, 1)) * scale[None, :, None]     # (9, Cout, Cin), scaled
    return jnp.transpose(w, (1, 0, 2)).reshape(cout, k * k * cin)


def basic_block_forward(x_nchw, params, *, images_per_step=None):
    """BasicBlock with stride=1, pad=1, dilation=1, downsample=None."""
    # TODO(synk): stride>1 / dilation>1 / 1x1-downsample BasicBlock variants used
    # elsewhere in LHDACTbone are not implemented by this kernel.
    (w1, s1, b1), (w2, s2, b2) = params
    N, C, H, W = x_nchw.shape
    HW = H * W
    Cmid = w1.shape[-1]
    Cout = w2.shape[-1]
    assert Cmid == C and Cout == C, "identity residual requires Cin == Cmid == Cout"
    assert W + 1 <= 128, "halo placement assumes W < 128"

    # Batching: Nb images per grid step (lane-dense compute width Nb*SLOT), while
    # keeping the grid >= 2 steps when N >= 2 so v7x can shard over both TCs.
    if images_per_step is None:
        images_per_step = max(1, min(16, -(-N // 2)))
    Nb = max(1, min(images_per_step, N))
    G = -(-N // Nb)                           # number of grid steps
    Npad = G * Nb

    S0 = 128                                   # halo before the first image (>= W+1)
    SLOT = _round_up(HW + W + 1, 128)          # lanes per image slot (>= HW+W+1)
    NW = Nb * SLOT                             # matmul / compute window width
    Wtot = NW + 2 * S0                         # pad-scratch width

    x_flat = x_nchw.reshape(N, C, HW)          # free reshape; NO jnp.pad of pixels
    if Npad != N:
        x_flat = jnp.concatenate(
            [x_flat, jnp.zeros((Npad - N, C, HW), x_flat.dtype)], axis=0)

    w1_t = _fold_bn_into_weight(w1, s1)        # BN scale folded into the weights
    w2_t = _fold_bn_into_weight(w2, s2)

    lane = jnp.arange(NW, dtype=jnp.int32)
    pos = lane % SLOT                          # pixel index within the image slot
    col = pos % W                              # output column index
    valid = pos < HW
    masks = jnp.stack([
        (valid & (col >= 1)).astype(jnp.float32),       # dx = -1 validity
        (valid & (col <= W - 2)).astype(jnp.float32),   # dx = +1 validity
        valid.astype(jnp.float32),                      # real-pixel lanes
    ], axis=0)                                          # (3, NW)

    kern = functools.partial(_basic_block_kernel, W=W, HW=HW, S0=S0, SLOT=SLOT,
                             Nb=Nb, NW=NW)
    out = pl.pallas_call(
        kern,
        out_shape=jax.ShapeDtypeStruct((Npad, Cout, HW), x_nchw.dtype),
        grid_spec=pltpu.PrefetchScalarGridSpec(
            num_scalar_prefetch=0,
            grid=(G,),
            in_specs=[
                pl.BlockSpec((Nb, C, HW), lambda n: (n, 0, 0)),
                # Weights / bias / masks are grid-invariant (constant index maps),
                # so Pallas does not re-DMA them per step.
                pl.BlockSpec((C, 9 * C), lambda n: (0, 0)),
                pl.BlockSpec((Cmid, 1), lambda n: (0, 0)),
                pl.BlockSpec((Cout, 9 * Cmid), lambda n: (0, 0)),
                pl.BlockSpec((Cout, 1), lambda n: (0, 0)),
                pl.BlockSpec((3, NW), lambda n: (0, 0)),
            ],
            out_specs=pl.BlockSpec((Nb, Cout, HW), lambda n: (n, 0, 0)),
            scratch_shapes=[
                pltpu.VMEM((C, Wtot), jnp.float32),      # slot-layout haloed input
                pltpu.VMEM((Cmid, Wtot), jnp.float32),   # slot-layout intermediate
                pltpu.VMEM((9 * C, NW), jnp.float32),    # im2col aggregation buffer
            ],
        ),
        compiler_params=pltpu.CompilerParams(
            dimension_semantics=("parallel",)),          # v7x: shard steps over TCs
    )(x_flat, w1_t, b1.reshape(Cmid, 1), w2_t, b2.reshape(Cout, 1), masks)
    return out[:N].reshape(N, Cout, H, W)                # already NCHW: no transposes


def make_params(key, inplanes, planes, eps=1e-5):
    """Deterministic params for conv1(+bn1) and conv2(+bn2)."""
    k1, k2, k3, k4 = jax.random.split(key, 4)
    fan1 = inplanes * 9
    fan2 = planes * 9
    w1 = jax.random.normal(k1, (3, 3, inplanes, planes), jnp.float32) / math.sqrt(fan1)
    w2 = jax.random.normal(k2, (3, 3, planes, planes), jnp.float32) / math.sqrt(fan2)
    # BatchNorm (eval-mode) parameters, fused to scale/bias.
    gamma1 = 1.0 + 0.1 * jax.random.normal(k3, (planes,), jnp.float32)
    beta1 = 0.05 * jnp.arange(planes, dtype=jnp.float32)
    mean1 = 0.01 * jnp.arange(planes, dtype=jnp.float32)
    var1 = jnp.ones((planes,), jnp.float32) * 0.9
    gamma2 = 1.0 + 0.1 * jax.random.normal(k4, (planes,), jnp.float32)
    beta2 = -0.03 * jnp.arange(planes, dtype=jnp.float32)
    mean2 = -0.02 * jnp.arange(planes, dtype=jnp.float32)
    var2 = jnp.ones((planes,), jnp.float32) * 1.1
    scale1 = gamma1 / jnp.sqrt(var1 + eps)
    bias1 = beta1 - mean1 * scale1
    scale2 = gamma2 / jnp.sqrt(var2 + eps)
    bias2 = beta2 - mean2 * scale2
    return (w1, scale1, bias1), (w2, scale2, bias2)


def _reference(x_nchw, params):
    """Pure-JAX reference (lax.conv) for correctness check."""
    (w1, s1, b1), (w2, s2, b2) = params
    x = jnp.transpose(x_nchw, (0, 2, 3, 1))
    dn = jax.lax.conv_dimension_numbers(x.shape, w1.shape,
                                        ('NHWC', 'HWIO', 'NHWC'))
    c1 = jax.lax.conv_general_dilated(x, w1, (1, 1), ((1, 1), (1, 1)),
                                      dimension_numbers=dn)
    o1 = jnp.maximum(c1 * s1 + b1, 0.0)
    c2 = jax.lax.conv_general_dilated(o1, w2, (1, 1), ((1, 1), (1, 1)),
                                      dimension_numbers=dn)
    o2 = c2 * s2 + b2 + x
    return jnp.transpose(o2, (0, 3, 1, 2))


if __name__ == "__main__":
    key = jax.random.PRNGKey(0)
    kx, kp = jax.random.split(key)
    N, C, H, W = 2, 4, 16, 16        # inplanes = planes = 4, stride = 1
    x = jax.random.normal(kx, (N, C, H, W), jnp.float32)
    params = make_params(kp, inplanes=C, planes=C)

    out = jax.block_until_ready(basic_block_forward(x, params))
    ref = jax.block_until_ready(_reference(x, params))
    if not np.allclose(np.asarray(out), np.asarray(ref), atol=1e-4, rtol=1e-4):
        raise AssertionError("Pallas fused BasicBlock does not match reference (N=2)")

    # Exercise the batched path: 8 images -> Nb=4 images per step, grid=(2,).
    x8 = jax.random.normal(kx, (8, C, H, W), jnp.float32)
    out8 = jax.block_until_ready(basic_block_forward(x8, params))
    ref8 = jax.block_until_ready(_reference(x8, params))
    if not np.allclose(np.asarray(out8), np.asarray(ref8), atol=1e-4, rtol=1e-4):
        raise AssertionError("Pallas fused BasicBlock does not match reference (N=8)")
    print("KERNEL_OK")
</pallas_src>

<mosaic_0001>
module attributes {stable_mosaic.version = 11 : i64} {
  func.func @_basic_block_kernel(%arg0: i32, %arg1: memref<1x4x256xf32, #tpu.memory_space<vmem>>, %arg2: memref<4x36xf32, #tpu.memory_space<vmem>>, %arg3: memref<4x1xf32, #tpu.memory_space<vmem>>, %arg4: memref<4x36xf32, #tpu.memory_space<vmem>>, %arg5: memref<4x1xf32, #tpu.memory_space<vmem>>, %arg6: memref<3x384xf32, #tpu.memory_space<vmem>>, %arg7: memref<1x4x256xf32, #tpu.memory_space<vmem>>, %arg8: memref<4x640xf32, #tpu.memory_space<vmem>>, %arg9: memref<4x640xf32, #tpu.memory_space<vmem>>, %arg10: memref<36x384xf32, #tpu.memory_space<vmem>>) attributes {dimension_semantics = [#tpu.dimension_semantics<parallel>], iteration_bounds = array<i64: 2>, scalar_prefetch = 0 : i64, scratch_operands = 3 : i64, tpu.core_type = #tpu.core_type<tc>, window_params = [{transform_indices = @transform_0, window_bounds = array<i64: 1, 4, 256>}, {pipeline_mode = #tpu.pipeline_mode<synchronous>, transform_indices = @transform_1, window_bounds = array<i64: 4, 36>}, {pipeline_mode = #tpu.pipeline_mode<synchronous>, transform_indices = @transform_2, window_bounds = array<i64: 4, 1>}, {pipeline_mode = #tpu.pipeline_mode<synchronous>, transform_indices = @transform_3, window_bounds = array<i64: 4, 36>}, {pipeline_mode = #tpu.pipeline_mode<synchronous>, transform_indices = @transform_4, window_bounds = array<i64: 4, 1>}, {pipeline_mode = #tpu.pipeline_mode<synchronous>, transform_indices = @transform_5, window_bounds = array<i64: 3, 384>}, {transform_indices = @transform_6, window_bounds = array<i64: 1, 4, 256>}]} {
    %cst = arith.constant 0.000000e+00 : f32
    %0 = vector.broadcast %cst : f32 to vector<4x128xf32>
    %cst_0 = arith.constant 0.000000e+00 : f32
    %1 = vector.broadcast %cst_0 : f32 to vector<4x128xf32>
    %c0 = arith.constant 0 : index
    %c0_1 = arith.constant 0 : index
    %2 = vector.load %arg8[%c0, %c0_1] : memref<4x640xf32, #tpu.memory_space<vmem>>, vector<4x128xf32>
    tpu.vector_store %arg8[%c0, %c0_1], %0 {strides = array<i32>} : memref<4x640xf32, #tpu.memory_space<vmem>>, vector<4x128xf32>,
    %c0_2 = arith.constant 0 : index
    %c512 = arith.constant 512 : index
    %3 = vector.load %arg8[%c0_2, %c512] : memref<4x640xf32, #tpu.memory_space<vmem>>, vector<4x128xf32>
    tpu.vector_store %arg8[%c0_2, %c512], %0 {strides = array<i32>} : memref<4x640xf32, #tpu.memory_space<vmem>>, vector<4x128xf32>,
    %c0_3 = arith.constant 0 : index
    %c0_4 = arith.constant 0 : index
    %4 = vector.load %arg9[%c0_3, %c0_4] : memref<4x640xf32, #tpu.memory_space<vmem>>, vector<4x128xf32>
    tpu.vector_store %arg9[%c0_3, %c0_4], %0 {strides = array<i32>} : memref<4x640xf32, #tpu.memory_space<vmem>>, vector<4x128xf32>,
    %c0_5 = arith.constant 0 : index
    %c512_6 = arith.constant 512 : index
    %5 = vector.load %arg9[%c0_5, %c512_6] : memref<4x640xf32, #tpu.memory_space<vmem>>, vector<4x128xf32>
    tpu.vector_store %arg9[%c0_5, %c512_6], %0 {strides = array<i32>} : memref<4x640xf32, #tpu.memory_space<vmem>>, vector<4x128xf32>,
    %c0_7 = arith.constant 0 : index
    %c0_8 = arith.constant 0 : index
    %c0_9 = arith.constant 0 : index
    %6 = vector.load %arg1[%c0_7, %c0_8, %c0_9] : memref<1x4x256xf32, #tpu.memory_space<vmem>>, vector<1x4x256xf32>
    %7 = vector.shape_cast %6 : vector<1x4x256xf32> to vector<4x256xf32>
    %c0_10 = arith.constant 0 : index
    %c128 = arith.constant 128 : index
    %8 = vector.load %arg8[%c0_10, %c128] : memref<4x640xf32, #tpu.memory_space<vmem>>, vector<4x256xf32>
    tpu.vector_store %arg8[%c0_10, %c128], %7 {strides = array<i32>} : memref<4x640xf32, #tpu.memory_space<vmem>>, vector<4x256xf32>,
    %c0_11 = arith.constant 0 : index
    %c384 = arith.constant 384 : index
    %9 = vector.load %arg8[%c0_11, %c384] : memref<4x640xf32, #tpu.memory_space<vmem>>, vector<4x128xf32>
    tpu.vector_store %arg8[%c0_11, %c384], %1 {strides = array<i32>} : memref<4x640xf32, #tpu.memory_space<vmem>>, vector<4x128xf32>,
    %c0_12 = arith.constant 0 : index
    %c0_13 = arith.constant 0 : index
    %10 = vector.load %arg6[%c0_12, %c0_13] : memref<3x384xf32, #tpu.memory_space<vmem>>, vector<1x384xf32>
    %c1 = arith.constant 1 : index
    %c0_14 = arith.constant 0 : index
    %11 = vector.load %arg6[%c1, %c0_14] : memref<3x384xf32, #tpu.memory_space<vmem>>, vector<1x384xf32>
    %c2 = arith.constant 2 : index
    %c0_15 = arith.constant 0 : index
    %12 = vector.load %arg6[%c2, %c0_15] : memref<3x384xf32, #tpu.memory_space<vmem>>, vector<1x384xf32>
    %c0_16 = arith.constant 0 : index
    %c0_17 = arith.constant 0 : index
    %13 = vector.load %arg2[%c0_16, %c0_17] : memref<4x36xf32, #tpu.memory_space<vmem>>, vector<4x36xf32>
    %c0_18 = arith.constant 0 : index
    %c0_19 = arith.constant 0 : index
    %14 = vector.load %arg4[%c0_18, %c0_19] : memref<4x36xf32, #tpu.memory_space<vmem>>, vector<4x36xf32>
    %c0_20 = arith.constant 0 : index
    %c0_21 = arith.constant 0 : index
    %15 = vector.load %arg3[%c0_20, %c0_21] : memref<4x1xf32, #tpu.memory_space<vmem>>, vector<4x1xf32>
    %c0_22 = arith.constant 0 : index
    %c0_23 = arith.constant 0 : index
    %16 = vector.load %arg5[%c0_22, %c0_23] : memref<4x1xf32, #tpu.memory_space<vmem>>, vector<4x1xf32>
    %c0_24 = arith.constant 0 : index
    %c111 = arith.constant 111 : index
    %17 = vector.load %arg8[%c0_24, %c111] : memref<4x640xf32, #tpu.memory_space<vmem>>, vector<4x384xf32>
    %18 = vector.broadcast %10 : vector<1x384xf32> to vector<4x384xf32>
    %19 = arith.mulf %17, %18 : vector<4x384xf32>
    %c0_25 = arith.constant 0 : index
    %c0_26 = arith.constant 0 : index
    %20 = vector.load %arg10[%c0_25, %c0_26] : memref<36x384xf32, #tpu.memory_space<vmem>>, vector<4x384xf32>
    tpu.vector_store %arg10[%c0_25, %c0_26], %19 {strides = array<i32>} : memref<36x384xf32, #tpu.memory_space<vmem>>, vector<4x384xf32>,
    %c0_27 = arith.constant 0 : index
    %c112 = arith.constant 112 : index
    %21 = vector.load %arg8[%c0_27, %c112] : memref<4x640xf32, #tpu.memory_space<vmem>>, vector<4x384xf32>
    %c4 = arith.constant 4 : index
    %c0_28 = arith.constant 0 : index
    %22 = vector.load %arg10[%c4, %c0_28] : memref<36x384xf32, #tpu.memory_space<vmem>>, vector<4x384xf32>
    tpu.vector_store %arg10[%c4, %c0_28], %21 {strides = array<i32>} : memref<36x384xf32, #tpu.memory_space<vmem>>, vector<4x384xf32>,
    %c0_29 = arith.constant 0 : index
    %c113 = arith.constant 113 : index
    %23 = vector.load %arg8[%c0_29, %c113] : memref<4x640xf32, #tpu.memory_space<vmem>>, vector<4x384xf32>
    %24 = vector.broadcast %11 : vector<1x384xf32> to vector<4x384xf32>
    %25 = arith.mulf %23, %24 : vector<4x384xf32>
    %c8 = arith.constant 8 : index
    %c0_30 = arith.constant 0 : index
    %26 = vector.load %arg10[%c8, %c0_30] : memref<36x384xf32, #tpu.memory_space<vmem>>, vector<4x384xf32>
    tpu.vector_store %arg10[%c8, %c0_30], %25 {strides = array<i32>} : memref<36x384xf32, #tpu.memory_space<vmem>>, vector<4x384xf32>,
    %c0_31 = arith.constant 0 : index
    %c127 = arith.constant 127 : index
    %27 = vector.load %arg8[%c0_31, %c127] : memref<4x640xf32, #tpu.memory_space<vmem>>, vector<4x384xf32>
    %28 = vector.broadcast %10 : vector<1x384xf32> to vector<4x384xf32>
    %29 = arith.mulf %27, %28 : vector<4x384xf32>
    %c12 = arith.constant 12 : index
    %c0_32 = arith.constant 0 : index
    %30 = vector.load %arg10[%c12, %c0_32] : memref<36x384xf32, #tpu.memory_space<vmem>>, vector<4x384xf32>
    tpu.vector_store %arg10[%c12, %c0_32], %29 {strides = array<i32>} : memref<36x384xf32, #tpu.memory_space<vmem>>, vector<4x384xf32>,
    %c0_33 = arith.constant 0 : index
    %c128_34 = arith.constant 128 : index
    %31 = vector.load %arg8[%c0_33, %c128_34] : memref<4x640xf32, #tpu.memory_space<vmem>>, vector<4x384xf32>
    %c16 = arith.constant 16 : index
    %c0_35 = arith.constant 0 : index
    %32 = vector.load %arg10[%c16, %c0_35] : memref<36x384xf32, #tpu.memory_space<vmem>>, vector<4x384xf32>
    tpu.vector_store %arg10[%c16, %c0_35], %31 {strides = array<i32>} : memref<36x384xf32, #tpu.memory_space<vmem>>, vector<4x384xf32>,
    %c0_36 = arith.constant 0 : index
    %c129 = arith.constant 129 : index
    %33 = vector.load %arg8[%c0_36, %c129] : memref<4x640xf32, #tpu.memory_space<vmem>>, vector<4x384xf32>
    %34 = vector.broadcast %11 : vector<1x384xf32> to vector<4x384xf32>
    %35 = arith.mulf %33, %34 : vector<4x384xf32>
    %c20 = arith.constant 20 : index
    %c0_37 = arith.constant 0 : index
    %36 = vector.load %arg10[%c20, %c0_37] : memref<36x384xf32, #tpu.memory_space<vmem>>, vector<4x384xf32>
    tpu.vector_store %arg10[%c20, %c0_37], %35 {strides = array<i32>} : memref<36x384xf32, #tpu.memory_space<vmem>>, vector<4x384xf32>,
    %c0_38 = arith.constant 0 : index
    %c143 = arith.constant 143 : index
    %37 = vector.load %arg8[%c0_38, %c143] : memref<4x640xf32, #tpu.memory_space<vmem>>, vector<4x384xf32>
    %38 = vector.broadcast %10 : vector<1x384xf32> to vector<4x384xf32>
    %39 = arith.mulf %37, %38 : vector<4x384xf32>
    %c24 = arith.constant 24 : index
    %c0_39 = arith.constant 0 : index
    %40 = vector.load %arg10[%c24, %c0_39] : memref<36x384xf32, #tpu.memory_space<vmem>>, vector<4x384xf32>
    tpu.vector_store %arg10[%c24, %c0_39], %39 {strides = array<i32>} : memref<36x384xf32, #tpu.memory_space<vmem>>, vector<4x384xf32>,
    %c0_40 = arith.constant 0 : index
    %c144 = arith.constant 144 : index
    %41 = vector.load %arg8[%c0_40, %c144] : memref<4x640xf32, #tpu.memory_space<vmem>>, vector<4x384xf32>
    %c28 = arith.constant 28 : index
    %c0_41 = arith.constant 0 : index
    %42 = vector.load %arg10[%c28, %c0_41] : memref<36x384xf32, #tpu.memory_space<vmem>>, vector<4x384xf32>
    tpu.vector_store %arg10[%c28, %c0_41], %41 {strides = array<i32>} : memref<36x384xf32, #tpu.memory_space<vmem>>, vector<4x384xf32>,
    %c0_42 = arith.constant 0 : index
    %c145 = arith.constant 145 : index
    %43 = vector.load %arg8[%c0_42, %c145] : memref<4x640xf32, #tpu.memory_space<vmem>>, vector<4x384xf32>
    %44 = vector.broadcast %11 : vector<1x384xf32> to vector<4x384xf32>
    %45 = arith.mulf %43, %44 : vector<4x384xf32>
    %c32 = arith.constant 32 : index
    %c0_43 = arith.constant 0 : index
    %46 = vector.load %arg10[%c32, %c0_43] : memref<36x384xf32, #tpu.memory_space<vmem>>, vector<4x384xf32>
    tpu.vector_store %arg10[%c32, %c0_43], %45 {strides = array<i32>} : memref<36x384xf32, #tpu.memory_space<vmem>>, vector<4x384xf32>,
    %c0_44 = arith.constant 0 : index
    %c0_45 = arith.constant 0 : index
    %47 = vector.load %arg10[%c0_44, %c0_45] : memref<36x384xf32, #tpu.memory_space<vmem>>, vector<36x384xf32>
    %cst_46 = arith.constant dense<0.000000e+00> : vector<4x384xf32>
    %48 = tpu.matmul %13, %47, %cst_46 {dimension_numbers = #tpu.dot_dimension_numbers<[1], [0], [0], [1], [0, 0, 1, 1], [], []>} : vector<4x36xf32>, vector<36x384xf32>, vector<4x384xf32> -> vector<4x384xf32>
    %49 = vector.broadcast %15 : vector<4x1xf32> to vector<4x384xf32>
    %50 = arith.addf %48, %49 : vector<4x384xf32>
    %cst_47 = arith.constant 0.000000e+00 : f32
    %51 = vector.broadcast %cst_47 : f32 to vector<4x384xf32>
    %52 = arith.maximumf %50, %51 : vector<4x384xf32>
    %53 = vector.broadcast %12 : vector<1x384xf32> to vector<4x384xf32>
    %54 = arith.mulf %52, %53 : vector<4x384xf32>
    %c0_48 = arith.constant 0 : index
    %c128_49 = arith.constant 128 : index
    %55 = vector.load %arg9[%c0_48, %c128_49] : memref<4x640xf32, #tpu.memory_space<vmem>>, vector<4x384xf32>
    tpu.vector_store %arg9[%c0_48, %c128_49], %54 {strides = array<i32>} : memref<4x640xf32, #tpu.memory_space<vmem>>, vector<4x384xf32>,
    %c0_50 = arith.constant 0 : index
    %c111_51 = arith.constant 111 : index
    %56 = vector.load %arg9[%c0_50, %c111_51] : memref<4x640xf32, #tpu.memory_space<vmem>>, vector<4x384xf32>
    %57 = vector.broadcast %10 : vector<1x384xf32> to vector<4x384xf32>
    %58 = arith.mulf %56, %57 : vector<4x384xf32>
    %c0_52 = arith.constant 0 : index
    %c0_53 = arith.constant 0 : index
    %59 = vector.load %arg10[%c0_52, %c0_53] : memref<36x384xf32, #tpu.memory_space<vmem>>, vector<4x384xf32>
    tpu.vector_store %arg10[%c0_52, %c0_53], %58 {strides = array<i32>} : memref<36x384xf32, #tpu.memory_space<vmem>>, vector<4x384xf32>,
    %c0_54 = arith.constant 0 : index
    %c112_55 = arith.constant 112 : index
    %60 = vector.load %arg9[%c0_54, %c112_55] : memref<4x640xf32, #tpu.memory_space<vmem>>, vector<4x384xf32>
    %c4_56 = arith.constant 4 : index
    %c0_57 = arith.constant 0 : index
    %61 = vector.load %arg10[%c4_56, %c0_57] : memref<36x384xf32, #tpu.memory_space<vmem>>, vector<4x384xf32>
    tpu.vector_store %arg10[%c4_56, %c0_57], %60 {strides = array<i32>} : memref<36x384xf32, #tpu.memory_space<vmem>>, vector<4x384xf32>,
    %c0_58 = arith.constant 0 : index
    %c113_59 = arith.constant 113 : index
    %62 = vector.load %arg9[%c0_58, %c113_59] : memref<4x640xf32, #tpu.memory_space<vmem>>, vector<4x384xf32>
    %63 = vector.broadcast %11 : vector<1x384xf32> to vector<4x384xf32>
    %64 = arith.mulf %62, %63 : vector<4x384xf32>
    %c8_60 = arith.constant 8 : index
    %c0_61 = arith.constant 0 : index
    %65 = vector.load %arg10[%c8_60, %c0_61] : memref<36x384xf32, #tpu.memory_space<vmem>>, vector<4x384xf32>
    tpu.vector_store %arg10[%c8_60, %c0_61], %64 {strides = array<i32>} : memref<36x384xf32, #tpu.memory_space<vmem>>, vector<4x384xf32>,
    %c0_62 = arith.constant 0 : index
    %c127_63 = arith.constant 127 : index
    %66 = vector.load %arg9[%c0_62, %c127_63] : memref<4x640xf32, #tpu.memory_space<vmem>>, vector<4x384xf32>
    %67 = vector.broadcast %10 : vector<1x384xf32> to vector<4x384xf32>
    %68 = arith.mulf %66, %67 : vector<4x384xf32>
    %c12_64 = arith.constant 12 : index
    %c0_65 = arith.constant 0 : index
    %69 = vector.load %arg10[%c12_64, %c0_65] : memref<36x384xf32, #tpu.memory_space<vmem>>, vector<4x384xf32>
    tpu.vector_store %arg10[%c12_64, %c0_65], %68 {strides = array<i32>} : memref<36x384xf32, #tpu.memory_space<vmem>>, vector<4x384xf32>,
    %c0_66 = arith.constant 0 : index
    %c128_67 = arith.constant 128 : index
    %70 = vector.load %arg9[%c0_66, %c128_67] : memref<4x640xf32, #tpu.memory_space<vmem>>, vector<4x384xf32>
    %c16_68 = arith.constant 16 : index
    %c0_69 = arith.constant 0 : index
    %71 = vector.load %arg10[%c16_68, %c0_69] : memref<36x384xf32, #tpu.memory_space<vmem>>, vector<4x384xf32>
    tpu.vector_store %arg10[%c16_68, %c0_69], %70 {strides = array<i32>} : memref<36x384xf32, #tpu.memory_space<vmem>>, vector<4x384xf32>,
    %c0_70 = arith.constant 0 : index
    %c129_71 = arith.constant 129 : index
    %72 = vector.load %arg9[%c0_70, %c129_71] : memref<4x640xf32, #tpu.memory_space<vmem>>, vector<4x384xf32>
    %73 = vector.broadcast %11 : vector<1x384xf32> to vector<4x384xf32>
    %74 = arith.mulf %72, %73 : vector<4x384xf32>
    %c20_72 = arith.constant 20 : index
    %c0_73 = arith.constant 0 : index
    %75 = vector.load %arg10[%c20_72, %c0_73] : memref<36x384xf32, #tpu.memory_space<vmem>>, vector<4x384xf32>
    tpu.vector_store %arg10[%c20_72, %c0_73], %74 {strides = array<i32>} : memref<36x384xf32, #tpu.memory_space<vmem>>, vector<4x384xf32>,
    %c0_74 = arith.constant 0 : index
    %c143_75 = arith.constant 143 : index
    %76 = vector.load %arg9[%c0_74, %c143_75] : memref<4x640xf32, #tpu.memory_space<vmem>>, vector<4x384xf32>
    %77 = vector.broadcast %10 : vector<1x384xf32> to vector<4x384xf32>
    %78 = arith.mulf %76, %77 : vector<4x384xf32>
    %c24_76 = arith.constant 24 : index
    %c0_77 = arith.constant 0 : index
    %79 = vector.load %arg10[%c24_76, %c0_77] : memref<36x384xf32, #tpu.memory_space<vmem>>, vector<4x384xf32>
    tpu.vector_store %arg10[%c24_76, %c0_77], %78 {strides = array<i32>} : memref<36x384xf32, #tpu.memory_space<vmem>>, vector<4x384xf32>,
    %c0_78 = arith.constant 0 : index
    %c144_79 = arith.constant 144 : index
    %80 = vector.load %arg9[%c0_78, %c144_79] : memref<4x640xf32, #tpu.memory_space<vmem>>, vector<4x384xf32>
    %c28_80 = arith.constant 28 : index
    %c0_81 = arith.constant 0 : index
    %81 = vector.load %arg10[%c28_80, %c0_81] : memref<36x384xf32, #tpu.memory_space<vmem>>, vector<4x384xf32>
    tpu.vector_store %arg10[%c28_80, %c0_81], %80 {strides = array<i32>} : memref<36x384xf32, #tpu.memory_space<vmem>>, vector<4x384xf32>,
    %c0_82 = arith.constant 0 : index
    %c145_83 = arith.constant 145 : index
    %82 = vector.load %arg9[%c0_82, %c145_83] : memref<4x640xf32, #tpu.memory_space<vmem>>, vector<4x384xf32>
    %83 = vector.broadcast %11 : vector<1x384xf32> to vector<4x384xf32>
    %84 = arith.mulf %82, %83 : vector<4x384xf32>
    %c32_84 = arith.constant 32 : index
    %c0_85 = arith.constant 0 : index
    %85 = vector.load %arg10[%c32_84, %c0_85] : memref<36x384xf32, #tpu.memory_space<vmem>>, vector<4x384xf32>
    tpu.vector_store %arg10[%c32_84, %c0_85], %84 {strides = array<i32>} : memref<36x384xf32, #tpu.memory_space<vmem>>, vector<4x384xf32>,
    %c0_86 = arith.constant 0 : index
    %c0_87 = arith.constant 0 : index
    %86 = vector.load %arg10[%c0_86, %c0_87] : memref<36x384xf32, #tpu.memory_space<vmem>>, vector<36x384xf32>
    %cst_88 = arith.constant dense<0.000000e+00> : vector<4x384xf32>
    %87 = tpu.matmul %14, %86, %cst_88 {dimension_numbers = #tpu.dot_dimension_numbers<[1], [0], [0], [1], [0, 0, 1, 1], [], []>} : vector<4x36xf32>, vector<36x384xf32>, vector<4x384xf32> -> vector<4x384xf32>
    %88 = vector.broadcast %16 : vector<4x1xf32> to vector<4x384xf32>
    %89 = arith.addf %87, %88 : vector<4x384xf32>
    %c0_89 = arith.constant 0 : index
    %c128_90 = arith.constant 128 : index
    %90 = vector.load %arg8[%c0_89, %c128_90] : memref<4x640xf32, #tpu.memory_space<vmem>>, vector<4x384xf32>
    %91 = arith.addf %89, %90 : vector<4x384xf32>
    %92 = vector.extract_strided_slice %91 {offsets = [0, 0], sizes = [4, 256], strides = [1, 1]} : vector<4x384xf32> to vector<4x256xf32>
    %c0_91 = arith.constant 0 : index
    %c0_92 = arith.constant 0 : index
    %c0_93 = arith.constant 0 : index
    %93 = vector.load %arg7[%c0_91, %c0_92, %c0_93] : memref<1x4x256xf32, #tpu.memory_space<vmem>>, vector<1x4x256xf32>
    %94 = vector.shape_cast %93 : vector<1x4x256xf32> to vector<4x256xf32>
    %95 = vector.shape_cast %92 : vector<4x256xf32> to vector<1x4x256xf32>
    tpu.vector_store %arg7[%c0_91, %c0_92, %c0_93], %95 {strides = array<i32>} : memref<1x4x256xf32, #tpu.memory_space<vmem>>, vector<1x4x256xf32>,
    return
  }
  func.func @transform_0(%arg0: i32) -> (i32, i32, i32) {
    %c0_i32 = arith.constant 0 : i32
    %c0_i32_0 = arith.constant 0 : i32
    %c0_i32_1 = arith.constant 0 : i32
    return %arg0, %c0_i32, %c0_i32_0 : i32, i32, i32
  }
  func.func @transform_1(%arg0: i32) -> (i32, i32) {
    %c0_i32 = arith.constant 0 : i32
    %c0_i32_0 = arith.constant 0 : i32
    %c0_i32_1 = arith.constant 0 : i32
    return %c0_i32, %c0_i32_0 : i32, i32
  }
  func.func @transform_2(%arg0: i32) -> (i32, i32) {
    %c0_i32 = arith.constant 0 : i32
    %c0_i32_0 = arith.constant 0 : i32
    %c0_i32_1 = arith.constant 0 : i32
    return %c0_i32, %c0_i32_0 : i32, i32
  }
  func.func @transform_3(%arg0: i32) -> (i32, i32) {
    %c0_i32 = arith.constant 0 : i32
    %c0_i32_0 = arith.constant 0 : i32
    %c0_i32_1 = arith.constant 0 : i32
    return %c0_i32, %c0_i32_0 : i32, i32
  }
  func.func @transform_4(%arg0: i32) -> (i32, i32) {
    %c0_i32 = arith.constant 0 : i32
    %c0_i32_0 = arith.constant 0 : i32
    %c0_i32_1 = arith.constant 0 : i32
    return %c0_i32, %c0_i32_0 : i32, i32
  }
  func.func @transform_5(%arg0: i32) -> (i32, i32) {
    %c0_i32 = arith.constant 0 : i32
    %c0_i32_0 = arith.constant 0 : i32
    %c0_i32_1 = arith.constant 0 : i32
    return %c0_i32, %c0_i32_0 : i32, i32
  }
  func.func @transform_6(%arg0: i32) -> (i32, i32, i32) {
    %c0_i32 = arith.constant 0 : i32
    %c0_i32_0 = arith.constant 0 : i32
    %c0_i32_1 = arith.constant 0 : i32
    return %arg0, %c0_i32, %c0_i32_0 : i32, i32, i32
  }
}

</mosaic_0001>

<bundles_post_ra>
// kernel: tpu_custom_call.1
= control target key start
LH: loop header
LB: loop body
LE: loop exit
PB: predicated region body
PF: predicated region fallthrough
CT: control target
= control target key end

     0   :  { %11 = vsyncpa [#allocation6], 0  ;;  %s1967_s0 = inlined_call_operand.hbm [shape: f32[2,4,256], index: 0, kind: input, shape index: {}]   ;;  %s1968_s1 = inlined_call_operand.vmem [shape: f32[4,36], index: 1, kind: input, shape index: {}]   ;;  %s1969_s2 = inlined_call_operand.vmem [shape: f32[4,1], index: 2, kind: input, shape index: {}]   ;;  %s1970_s3 = inlined_call_operand.vmem [shape: f32[4,36], index: 3, kind: input, shape index: {}]   ;;  %s1971_s4 = inlined_call_operand.vmem [shape: f32[4,1], index: 4, kind: input, shape index: {}]   ;;  %s1972_s5 = inlined_call_operand.vmem [shape: f32[3,384], index: 5, kind: input, shape index: {}]   ;;  %s1973_s6 = inlined_call_operand.hbm [shape: f32[2,4,256], index: 6, kind: output, shape index: {}]  }
   0x1   :  { %13 = vsyncpa [#allocation6 + $0x1], 0 }
   0x2   :  { %14 = vsyncpa [#allocation7], 0 }
   0x3   :  { %16 = vsyncpa [#allocation7 + $0x1], 0  ;;  %s1471_s21 = smov 0   ;;  %s1473_s22 = smov 0  }
   0x4   :  { %s1475_s23 = smov 0   ;;  %s1477_s24 = smov 0  }
   0x5 LB: > { %s1492_s25 = sadd.s32 4294967295, %s1420_s24   ;;  %s1188_s26 = sadd.s32 4294967294, %s1420_s24   ;;  %s1420_s24 = sphi %s1477_s24, %s1988_s24   ;;  %s1416_s23 = sphi %s1475_s23, %s1987_s23   ;;  %s1412_s22 = sphi %s1473_s22, %s1986_s22   ;;  %s1408_s21 = sphi %s1471_s21, %s1985_s21  }
   0x6   : > { %s1496_s27 = sadd.s32 1, %s1420_s24   ;;  %s29_s28 = sadd.s32 1, %s1416_s23 }
   0x7   : > { %s26_s29 = ssub.s32 %s1420_s24, %s1496_s27  ;;  %p36_p0 = scmp.ne.s32.totalorder %s1416_s23, %s1412_s22 }
   0x8   : > { %p27_p1 = scmp.eq.s32.totalorder %s26_s29, 0  ;;  %p37_p2 = scmp.eq.s32.totalorder %s1420_s24, 0 }
   0x9   : > { %p42_p3 = scmp.ne.s32.totalorder %s1412_s22, %s1408_s21  ;;  %p43_p4 = scmp.eq.s32.totalorder %s1492_s25, 0 }
   0xa   : > { %s1508_s30 = scalar_select %p27_p1, %s1416_s23, %s29_s28  }
   0xb   : > { %p1510_p5 = por %p37_p2, %p36_p0  ;;  %p1514_p6 = por %p43_p4, %p42_p3 }
   0xc   : > { %p171_p7 = scmp.eq.s32.totalorder %s1492_s25, 1  ;;  %p177_p8 = scmp.eq.s32.totalorder %s1188_s26, 1 }
   0xd   : > { %p1267_p10 = scmp.lt.s32.totalorder %s1420_s24, 2  ;;  %s212_s11 = sand.u32 1, %s1416_s23  }
   0xe   : > { %p1521_p11 = por %p171_p7, %p36_p0  ;;  %p1525_p12 = por %p177_p8, %p42_p3 }
   0xf   : > { %s1212_s12 = sshll.u32 %s1420_s24, 7  ;;  %s1191_s13 = sshll.u32 %s212_s11, 3 }
  0x10   : > { %s1977_s9 = scalar_select %p1521_p11, 1, 0 }
  0x11   : > { %s1978_s10 = scalar_select %p1525_p12, 1, 0 }
  0x12   : > { %s1534_s16 = scalar_lea.hbm %s1967_s0, %s1212_s12  ;;  %s216_s17 = scalar_lea.vmem [#allocation5], %s1191_s13 }
  0x13   : > { %s224_s18 = sshll.u32 %s216_s17, 4  ;;  %p1538_p13 = pnand %p1267_p10, %p1510_p5  ;;  %s1542_s18 = int_to_ptr.vmem [resolvable:$true] %s224_s18 }
  0x14   : > { %s213_s20 = scalar_lea.sflag [#allocation6], %s212_s11  ;;  %s1324_s26 = scalar_lea.hbm %s1534_s16, 128 }
  0x15   : > { %p1325_p2 = scmp.ne.s32.totalorder %s1534_s16, %s1324_s26  ;;  %p1326_p3 = pneg %p1538_p13 }
  0x16   : > { %s1329_s7 = scalar_lea.hbm %s1967_s0, 256  ;;  %p1330_p5 = scmp.lt.u32.totalorder %s1534_s16, %s1967_s0 }
  0x17   : > { %p1327_p4 = pnand %p1326_p3, %p1325_p2  ;;  %p1331_p8 = scmp.lt.u32.totalorder %s1329_s7, %s1324_s26 }
  0x18   : > { %p1333_p9 = scmp.lt.u32.totalorder %s1324_s26, %s1534_s16 }
  0x19   : > { %p1328_p7 = pneg %p1327_p4  ;;  %p1332_p10 = por %p1331_p8, %p1330_p5 }
  0x1b   : > { %p1334_p0 = por %p1333_p9, %p1332_p10 }
  0x1d   : > { %p1335_p1 = pnand %p1334_p0, %p1328_p7 }
  0x1f   : > { %1338 = shalt.err (!%p1335_p1)
}
  0x20   : > { %s1339_s11 = scalar_lea.vmem %s1542_s18, 128  ;;  %s1422_s14 = smov [#allocation5]  }
  0x21   : > { %p1340_p2 = scmp.ne.s32.totalorder %s1542_s18, %s1339_s11  ;;  %s1344_s15 = sshll.u32 %s1422_s14, 4  ;;  %s1345_s15 = int_to_ptr.vmem [resolvable:$false] %s1344_s15 }
  0x22   : > { %s1346_s17 = scalar_lea.vmem %s1345_s15, 256  ;;  %p1347_p11 = scmp.lt.s32.totalorder %s1542_s18, %s1345_s15 }
  0x23   : > { %p1342_p4 = pnand %p1340_p2, %p1326_p3  ;;  %p1348_p5 = scmp.lt.s32.totalorder %s1346_s17, %s1339_s11 }
  0x25   : > { %p1343_p12 = pneg %p1342_p4  ;;  %p1349_p8 = por %p1348_p5, %p1347_p11 }
  0x27   : > { %p1350_p9 = pnand %p1349_p8, %p1343_p12 }
  0x29   : > { %1353 = shalt.err (!%p1350_p9)
}
  0x2a   : > { %1262 = dma.hbm_to_vmem [thread:$0]  (!%p1538_p13), %s1534_s16, 128, %s1542_s18, %s213_s20  }
  0x2b   : > { %p1980_p0 = scmp.lt.s32.totalorder %s1420_s24, 3  ;;  %p1981_p1 = scmp.ge.s32.totalorder %s1420_s24, 1 }
  0x2d   : > { %p230_p3 = pnand %p1981_p1, %p1980_p0 }
  0x2e   : > { %s1576_s26 = sand.u32 (!%p230_p3), 1, %s1412_s22  }
  0x2f   : > { %233 = sbr.rel (%p230_p3) target bundleno = 1004 (0x3ec), region = 44  ;;  %s1195_s28 = sshll.u32 (!%p230_p3), %s1576_s26, 3 }
  0x30   : > { %s236_s29 = scalar_lea.sflag (!%p230_p3), [#allocation6], %s1576_s26  ;;  %s239_s19 = scalar_lea.vmem (!%p230_p3), [#allocation5], %s1195_s28 }
  0x36   : > { %1399 = dma.done.wait (%p1514_p6), %s236_s29, 128  }
  0x37   : > { %1401 = vsyncadd (%p1514_p6), %s236_s29, 4294967168  ;;  %v287_v0 = vlaneseq  ;;  %v1423_v1 = vmov 0.0   ;;  %v1197_v6 = vld [vmem:[%s1972_s5 + $0x1] ss:$4 sm:$0x7]  ;;  %s1424_s7 = smov 113  }
  0x38   : > { %274 = vst [vmem:[#allocation2 + $0xc] sm:$0xf] %v1423_v1  ;;  %268 = vst [vmem:[#allocation2] sm:$0xf] %v1423_v1  ;;  %688 = vmatprep.mubr.f32.mxu0 %v1423_v1  ;;  %v1608_v12 = vld [vmem:[%s239_s19] sm:$0xff]  ;;  %s1425_s12 = smov 127  }
  0x39   : > { %269 = vst [vmem:[#allocation2 + $0x10] sm:$0xf] %v1423_v1  ;;  %270 = vst [vmem:[#allocation3] sm:$0xf] %v1423_v1  ;;  %v288_v2 = vshrl.u32 %v287_v0, 7  ;;  %s1426_s13 = smov 111   ;;  %v535_v21 = vcombine.low %v1608_v12, %v1608_v12 }
  0x3a   : > { %271 = vst [vmem:[#allocation3 + $0x10] sm:$0xf] %v1423_v1  ;;  %v275_v7 = vld [vmem:[%s1972_s5] ss:$4 sm:$0x7]  ;;  %273 = vst [vmem:[#allocation2 + $0x4] sm:$0xff] %v1608_v12 }
  0x3b   : > { %v1592_v3 = vsub.s32 2, %v288_v2  ;;  %v1594_v4 = vsub.s32 0, %v288_v2  ;;  %v1596_v5 = vsub.s32 1, %v288_v2  ;;  %456 = vst [vmem:[#allocation4 + $0x30] sm:$0xf] %v1608_v12  ;;  %s1427_s11 = smov 1  }
  0x3c   : > { %s1428_s14 = smov 15   ;;  %s1429_s15 = smov 17   ;;  %vm421_vm0 = vcmask 1039360   ;;  %vm306_vm1 = vcmask 908288   ;;  %vm383_vm2 = vcmask 924672   ;;  %vm308_vm3 = vcmask 1043456  }
  0x3d   : > { %v375_v8 = vrot.slane %v1197_v6, %v1592_v3  ;;  %v298_v9 = vrot.slane %v275_v7, %v1592_v3  ;;  %v290_v10 = vrot.slane %v275_v7, %v1594_v4  ;;  %v294_v11 = vrot.slane %v275_v7, %v1596_v5  ;;  %s1430_s17 = smov 16   ;;  %s1431_s29 = smov 112  }
  0x3e   : > { %v367_v14 = vrot.slane %v1197_v6, %v1594_v4  ;;  %v371_v15 = vrot.slane %v1197_v6, %v1596_v5  ;;  %vm403_vm4 = vcmask 121856   ;;  %vm441_vm5 = vcmask 7168   ;;  %s1104_s18 = scalar_lea.sflag [#allocation7], %s1576_s26  ;;  %p1982_p11 = scmp.ne.s32.totalorder %s1977_s9, 0 }
  0x3f   : > { %379 = vrot.lane.b32.xlu1 %v375_v8, %s1424_s7  ;;  %417 = vrot.lane.b32.xlu0 %v298_v9, %s1425_s12  ;;  %v299_v13 = vcombine.low %v290_v10, %v294_v11  ;;  %vm351_vm6 = vcmask 130048   ;;  %vm545_vm7 = vcmask 916480   ;;  %vm327_vm8 = vcmask 138240  }
  0x40   : > { %v376_v16 = vcombine.low %v367_v14, %v371_v15  ;;  %v1637_v22 = vld [vmem:[#allocation2 + $0xc] sm:$0xff]  ;;  %vm1433_vm9 = vmmov 0   ;;  %vm611_vm10 = vcmask 293888  }
  0x41   : > { %v1624_v17 = vld [vmem:[#allocation2 + $0x8] sm:$0xff]  ;;  %v337_v19 = vld [vmem:[#allocation2] sm:$0xff]  ;;  %v536_v23 = vcombine.low %v1637_v22, %v1637_v22  ;;  %1230 = vmatprep.mubr.msk.f32.mxu1 %vm1433_vm9, %v1423_v1 }
  0x42   : > { %v342_v18 = vcombine.low %v1624_v17, %v1624_v17  ;;  %v341_v20 = vcombine.low %v337_v19, %v337_v19 }
  0x43   : > { %302 = vrot.lane.b32.xlu0 %v298_v9, %s1426_s13  ;;  %300 = vrot.lane.b32.xlu1 %v299_v13, %s1426_s13 }
  0x47   : > { %377 = vrot.lane.b32.xlu1 %v376_v16, %s1424_s7  ;;  %415 = vrot.lane.b32.xlu0 %v299_v13, %s1425_s12 }
  0x4b   : > { %463 = vrot.lane.b32.xlu1 %v375_v8, %s1427_s11  ;;  %461 = vrot.lane.b32.xlu0 %v376_v16, %s1427_s11 }
  0x4f   : > { %499 = vrot.lane.b32.xlu1 %v298_v9, %s1428_s14  ;;  %497 = vrot.lane.b32.xlu0 %v299_v13, %s1428_s14 }
  0x53   : > { %557 = vrot.lane.b32.xlu0 %v376_v16, %s1429_s15  ;;  %559 = vrot.lane.b32.xlu1 %v375_v8, %s1429_s15 }
  0x57   : > { %347 = vrot.lane.b32.xlu1 %v342_v18, %s1430_s17  ;;  %345 = vrot.lane.b32.xlu0 %v337_v19, %s1430_s17 }
  0x5b   : > { %343 = vrot.lane.b32.xlu1 %v341_v20, %s1430_s17  ;;  %539 = vrot.lane.b32.xlu0 %v1608_v12, %s1431_s29 }
  0x5f   : > { %349 = vrot.lane.b32.xlu1 %v1624_v17, %s1430_s17  ;;  %537 = vrot.lane.b32.xlu0 %v535_v21, %s1431_s29 }
  0x63   : > { %541 = vrot.lane.b32.xlu1 %v536_v23, %s1431_s29 }
  0xb1   : > { %v380_v24 = vpop.permute.xlu1 %379  ;;  %v418_v25 = vpop.permute.xlu0 %417 }
  0xb2   : > { %v382_v45 = vrot.slane %v380_v24, 4  ;;  %v420_v55 = vrot.slane %v418_v25, 4 }
  0xb5   : > { %v303_v26 = vpop.permute.xlu0 %302  ;;  %v301_v27 = vpop.permute.xlu1 %300 }
  0xb6   : > { %v304_v30 = vrot.slane %v301_v27, 4  ;;  %v305_v38 = vrot.slane %v303_v26, 4 }
  0xb8   : > { %v1646_v32 = vsel %vm306_vm1, %v304_v30, %v301_v27  ;;  %v309_v46 = vsel %vm308_vm3, %v304_v30, %v305_v38 }
  0xb9   : > { %v378_v28 = vpop.permute.xlu1 %377  ;;  %v416_v29 = vpop.permute.xlu0 %415  ;;  %v313_v39 = vmul.f32 %v337_v19, %v1646_v32  ;;  %v1678_v53 = vsel %vm306_vm1, %v309_v46, %v303_v26 }
  0xba   : > { %v419_v31 = vrot.slane %v416_v29, 4  ;;  %v381_v37 = vrot.slane %v378_v28, 4  ;;  %v314_v57 = vmul.f32 %v1624_v17, %v1678_v53 }
  0xbb   : > { %v317_v2 = vcombine.high %v313_v39, %v313_v39 }
  0xbc   : > { %v1649_v33 = vsel %vm421_vm0, %v419_v31, %v416_v29  ;;  %v1660_v40 = vsel %vm383_vm2, %v381_v37, %v378_v28  ;;  %v385_v54 = vsel %vm308_vm3, %v381_v37, %v382_v45  ;;  %v423_v62 = vsel %vm308_vm3, %v419_v31, %v420_v55  ;;  %v452_v37 = vld [vmem:[#allocation2 + $0xc] sm:$0xf] }
  0xbd   : > { %v1652_v34 = vmul.f32 %v1649_v33, %v337_v19  ;;  %v1654_v35 = vpop.permute.xlu1 %463  ;;  %v462_v36 = vpop.permute.xlu0 %461  ;;  %v389_v47 = vmul.f32 %v1660_v40, %v337_v19  ;;  %v1688_v60 = vsel %vm383_vm2, %v385_v54, %v380_v24  ;;  %v1697_v8 = vsel %vm421_vm0, %v423_v62, %v418_v25  ;;  %458 = vst [vmem:[#allocation4 + $0x40] sm:$0xf] %v452_v37 }
  0xbe   : > { %v465_v43 = vrot.slane %v462_v36, 4  ;;  %v390_v0 = vmul.f32 %v1688_v60, %v1624_v17  ;;  %v466_v10 = vrot.slane %v1654_v35, 4  ;;  %v428_v13 = vmul.f32 %v1697_v8, %v1624_v17 }
  0xbf   : > { %435 = vrot.lane.b32.xlu0 %v1652_v34, %s1427_s11  ;;  %v393_v14 = vcombine.high %v389_v47, %v389_v47  ;;  %v1737_v31 = vcombine.high %v1608_v12, %v1608_v12  ;;  %v1434_v54 = vmov 0  }
  0xc0   : > { %v1675_v52 = vsel %vm441_vm5, %v465_v43, %v462_v36  ;;  %v468_v21 = vsel %vm308_vm3, %v465_v43, %v466_v10  ;;  %v318_v36 = vcombine.high %v314_v57, %v314_v57  ;;  %1313 = vset.pattern.permute.xlu0 %v1434_v54 }
  0xc1   : > { %v500_v41 = vpop.permute.xlu1 %499  ;;  %v498_v42 = vpop.permute.xlu0 %497  ;;  %v472_v56 = vmul.f32 %v1675_v52, %v1608_v12  ;;  %v1720_v25 = vsel %vm441_vm5, %v468_v21, %v1654_v35  ;;  %v431_v35 = vcombine.low %v1652_v34, %v1652_v34  ;;  %457 = vst [vmem:[#allocation4 + $0x38] sm:$0xf] %v1737_v31 }
  0xc2   : > { %v501_v44 = vrot.slane %v498_v42, 4  ;;  %v502_v63 = vrot.slane %v500_v41, 4  ;;  %v473_v28 = vmul.f32 %v1637_v22, %v1720_v25 }
  0xc3   : > { %319 = vrot.lane.b32.xlu0 %v313_v39, %s1429_s15  ;;  %v476_v29 = vcombine.low %v472_v56, %v472_v56  ;;  %v1432_v39 = vmov 0.0|0.0  }
  0xc4   : > { %v1666_v48 = vsel %vm403_vm4, %v501_v44, %v498_v42  ;;  %v504_v11 = vsel %vm308_vm3, %v501_v44, %v502_v63  ;;  %1241 = vmatprep.subr.bf16.mxu1 %v1432_v39  ;;  %v394_v42 = vcombine.high %v390_v0, %v390_v0  ;;  %v477_v44 = vcombine.low %v473_v28, %v473_v28 }
  0xc5   : > { %v508_v49 = vmul.f32 %v1666_v48, %v1608_v12  ;;  %v1670_v50 = vpop.permute.xlu0 %557  ;;  %v1672_v51 = vpop.permute.xlu1 %559  ;;  %v1707_v18 = vsel %vm403_vm4, %v504_v11, %v500_v41  ;;  %v432_v41 = vcombine.low %v428_v13, %v428_v13 }
  0xc6   : > { %v509_v17 = vmul.f32 %v1637_v22, %v1707_v18  ;;  %v561_v27 = vrot.slane %v1670_v50, 4  ;;  %v562_v43 = vrot.slane %v1672_v51, 4 }
  0xc7   : > { %514 = vrot.lane.b32.xlu1 %v508_v49, %s1424_s7  ;;  %395 = vrot.lane.b32.xlu0 %v389_v47, %s1428_s14  ;;  %v512_v23 = vcombine.high %v508_v49, %v508_v49 }
  0xc8   : > { %v1733_v30 = vsel %vm327_vm8, %v561_v27, %v1670_v50  ;;  %v564_v45 = vsel %vm308_vm3, %v561_v27, %v562_v43  ;;  %v513_v46 = vcombine.high %v509_v17, %v509_v17  ;;  %v282_v50 = vld [vmem:[%s1969_s2] sm:$0xf] }
  0xc9   : > { %v348_v58 = vpop.permute.xlu1 %347  ;;  %v346_v59 = vpop.permute.xlu0 %345  ;;  %v568_v38 = vmul.f32 %v1733_v30, %v1608_v12  ;;  %v1755_v47 = vsel %vm327_vm8, %v564_v45, %v1672_v51 }
  0xca   : > { %v353_v61 = vsel %vm351_vm6, %v346_v59, %v348_v58  ;;  %v569_v49 = vmul.f32 %v1755_v47, %v1637_v22 }
  0xcb   : > { %323 = vrot.lane.b32.xlu1 %v314_v57, %s1429_s15  ;;  %480 = vrot.lane.b32.xlu0 %v472_v56, %s1425_s12  ;;  %359 = vst [vmem:[#allocation4 + $0x8] sm:$0xf0] %v353_v61  ;;  %v572_v34 = vcombine.high %v568_v38, %v568_v38 }
  0xcc   : > { %v573_v51 = vcombine.high %v569_v49, %v569_v49 }
  0xcd   : > { %v344_v6 = vpop.permute.xlu1 %343  ;;  %v540_v7 = vpop.permute.xlu0 %539 }
  0xce   : > { %v352_v9 = vsel %vm351_vm6, %v344_v6, %v346_v59 }
  0xcf   : > { %399 = vrot.lane.b32.xlu1 %v390_v0, %s1428_s14  ;;  %321 = vrot.lane.b32.xlu0 %v317_v2, %s1429_s15  ;;  %358 = vst [vmem:[#allocation4] sm:$0xf0] %v352_v9 }
  0xd1   : > { %v350_v15 = vpop.permute.xlu1 %349  ;;  %v538_v16 = vpop.permute.xlu0 %537 }
  0xd2   : > { %v354_v19 = vsel %vm351_vm6, %v348_v58, %v350_v15  ;;  %v546_v20 = vsel %vm545_vm7, %v538_v16, %v540_v7 }
  0xd3   : > { %439 = vrot.lane.b32.xlu1 %v428_v13, %s1427_s11  ;;  %397 = vrot.lane.b32.xlu0 %v393_v14, %s1428_s14  ;;  %360 = vst [vmem:[#allocation4 + $0x10] sm:$0xf0] %v354_v19  ;;  %552 = vst [vmem:[#allocation4 + $0x48] sm:$0xf0] %v546_v20 }
  0xd5   : > { %v1716_v24 = vpop.permute.xlu1 %541 }
  0xd6   : > { %v547_v26 = vsel %vm545_vm7, %v540_v7, %v1716_v24 }
  0xd7   : > { %518 = vrot.lane.b32.xlu1 %v509_v17, %s1424_s7  ;;  %516 = vrot.lane.b32.xlu0 %v512_v23, %s1424_s7  ;;  %553 = vst [vmem:[#allocation4 + $0x50] sm:$0xf0] %v547_v26 }
  0xdb   : > { %484 = vrot.lane.b32.xlu1 %v473_v28, %s1425_s12  ;;  %478 = vrot.lane.b32.xlu0 %v476_v29, %s1425_s12 }
  0xdf   : > { %433 = vrot.lane.b32.xlu1 %v431_v35, %s1427_s11  ;;  %325 = vrot.lane.b32.xlu0 %v318_v36, %s1429_s15 }
  0xe3   : > { %437 = vrot.lane.b32.xlu1 %v432_v41, %s1427_s11  ;;  %401 = vrot.lane.b32.xlu0 %v394_v42, %s1428_s14 }
  0xe7   : > { %482 = vrot.lane.b32.xlu1 %v477_v44, %s1425_s12  ;;  %576 = vrot.lane.b32.xlu0 %v572_v34, %s1426_s13 }
  0xeb   : > { %543 = vrot.lane.b32.xlu1 %v1637_v22, %s1431_s29  ;;  %520 = vrot.lane.b32.xlu0 %v513_v46, %s1424_s7 }
  0xef   : > { %578 = vrot.lane.b32.xlu1 %v569_v49, %s1426_s13  ;;  %574 = vrot.lane.b32.xlu0 %v568_v38, %s1426_s13 }
  0xf3   : > { %580 = vrot.lane.b32.xlu1 %v573_v51, %s1426_s13  ;;  %608 = vperm.xlu0 %1313, %v282_v50  }
 0x131   : > { %v436_v55 = vpop.permute.xlu0 %435 }
 0x135   : > { %v320_v56 = vpop.permute.xlu0 %319 }
 0x139   : > { %v515_v22 = vpop.permute.xlu1 %514  ;;  %v396_v57 = vpop.permute.xlu0 %395 }
 0x13d   : > { %v324_v58 = vpop.permute.xlu1 %323  ;;  %v481_v59 = vpop.permute.xlu0 %480 }
 0x141   : > { %v400_v61 = vpop.permute.xlu1 %399  ;;  %v322_v62 = vpop.permute.xlu0 %321 }
 0x142   : > { %v328_v63 = vsel %vm327_vm8, %v320_v56, %v322_v62  ;;  %v329_v0 = vsel %vm327_vm8, %v322_v62, %v324_v58 }
 0x143   : > { %334 = vst [vmem:[#allocation4] sm:$0xf] %v328_v63  ;;  %335 = vst [vmem:[#allocation4 + $0x8] sm:$0xf] %v329_v0 }
 0x145   : > { %v440_v2 = vpop.permute.xlu1 %439  ;;  %v398_v6 = vpop.permute.xlu0 %397 }
 0x146   : > { %v404_v7 = vsel %vm403_vm4, %v396_v57, %v398_v6  ;;  %v405_v9 = vsel %vm403_vm4, %v398_v6, %v400_v61 }
 0x147   : > { %410 = vst [vmem:[#allocation4 + $0x18] sm:$0xf] %v404_v7  ;;  %411 = vst [vmem:[#allocation4 + $0x20] sm:$0xf] %v405_v9 }
 0x149   : > { %v519_v10 = vpop.permute.xlu1 %518  ;;  %v517_v11 = vpop.permute.xlu0 %516 }
 0x14a   : > { %v522_v13 = vsel %vm383_vm2, %v515_v22, %v517_v11  ;;  %v523_v14 = vsel %vm383_vm2, %v517_v11, %v519_v10  ;;  %v592_v34 = vld [vmem:[#allocation4 + $0x8] sm:$0xff]  ;;  %v591_v56 = vld [vmem:[#allocation4] sm:$0xff] }
 0x14b   : > { %528 = vst [vmem:[#allocation4 + $0x48] sm:$0xf] %v522_v13  ;;  %529 = vst [vmem:[#allocation4 + $0x50] sm:$0xf] %v523_v14  ;;  %v280_v14 = vld [vmem:[%s1968_s1] sm:$0xf] }
 0x14d   : > { %v485_v15 = vpop.permute.xlu1 %484  ;;  %v479_v16 = vpop.permute.xlu0 %478 }
 0x14e   : > { %v486_v19 = vsel %vm421_vm0, %v479_v16, %v481_v59 }
 0x14f   : > { %492 = vst [vmem:[#allocation4 + $0x30] sm:$0xf0] %v486_v19  ;;  %v1198_v19 = vld [vmem:[%s1972_s5 + $0x2] ss:$4 sm:$0x7] }
 0x151   : > { %v434_v20 = vpop.permute.xlu1 %433  ;;  %v326_v21 = vpop.permute.xlu0 %325 }
 0x152   : > { %v442_v17 = vsel %vm441_vm5, %v434_v20, %v436_v55  ;;  %v330_v23 = vsel %vm327_vm8, %v324_v58, %v326_v21  ;;  %v601_v63 = vld [vmem:[#allocation4 + $0x50] sm:$0xff] }
 0x153   : > { %448 = vst [vmem:[#allocation4 + $0x18] sm:$0xf0] %v442_v17  ;;  %336 = vst [vmem:[#allocation4 + $0x10] sm:$0xf] %v330_v23  ;;  %v772_v23 = vrot.slane %v1198_v19, %v1594_v4 }
 0x155   : > { %v438_v26 = vpop.permute.xlu1 %437  ;;  %v402_v27 = vpop.permute.xlu0 %401 }
 0x156   : > { %v443_v28 = vsel %vm441_vm5, %v436_v55, %v438_v26  ;;  %v444_v29 = vsel %vm441_vm5, %v438_v26, %v440_v2  ;;  %v406_v35 = vsel %vm403_vm4, %v400_v61, %v402_v27  ;;  %v600_v2 = vld [vmem:[#allocation4 + $0x48] sm:$0xff]  ;;  %v776_v27 = vrot.slane %v1198_v19, %v1596_v5 }
 0x157   : > { %449 = vst [vmem:[#allocation4 + $0x20] sm:$0xf0] %v443_v28  ;;  %450 = vst [vmem:[#allocation4 + $0x28] sm:$0xf0] %v444_v29 }
 0x158   : > { %412 = vst [vmem:[#allocation4 + $0x28] sm:$0xf] %v406_v35 }
 0x159   : > { %v483_v36 = vpop.permute.xlu1 %482  ;;  %v577_v37 = vpop.permute.xlu0 %576 }
 0x15a   : > { %v487_v38 = vsel %vm421_vm0, %v481_v59, %v483_v36  ;;  %v488_v41 = vsel %vm421_vm0, %v483_v36, %v485_v15  ;;  %v594_v44 = vld [vmem:[#allocation4 + $0x18] sm:$0xff]  ;;  %v593_v50 = vld [vmem:[#allocation4 + $0x10] sm:$0xff] }
 0x15b   : > { %493 = vst [vmem:[#allocation4 + $0x38] sm:$0xf0] %v487_v38  ;;  %494 = vst [vmem:[#allocation4 + $0x40] sm:$0xf0] %v488_v41  ;;  %v1235_v22 = vpack.c.bf16 %v594_v44, %v591_v56  ;;  %v597_v59 = vld [vmem:[#allocation4 + $0x30] sm:$0xff] }
 0x15c   : > { %v1239_v6 = vpack.c.bf16 %v600_v2, %v597_v59 }
 0x15d   : > { %v544_v42 = vpop.permute.xlu1 %543  ;;  %v521_v43 = vpop.permute.xlu0 %520 }
 0x15e   : > { %v548_v45 = vsel %vm545_vm7, %v1716_v24, %v544_v42  ;;  %v524_v46 = vsel %vm383_vm2, %v519_v10, %v521_v43  ;;  %v595_v49 = vld [vmem:[#allocation4 + $0x20] sm:$0xff] }
 0x15f   : > { %v596_v51 = vld [vmem:[#allocation4 + $0x28] sm:$0xff]  ;;  %554 = vst [vmem:[#allocation4 + $0x58] sm:$0xf0] %v548_v45  ;;  %530 = vst [vmem:[#allocation4 + $0x58] sm:$0xf] %v524_v46  ;;  %v1233_v54 = vpack.c.bf16 %v595_v49, %v592_v34 }
 0x160   : > { %v1242_v55 = vpack.c.bf16 %v596_v51, %v593_v50 }
 0x161   : > { %v579_v57 = vpop.permute.xlu1 %578  ;;  %1234 = vmatprep.subr.bf16.mxu0 %v1233_v54  ;;  %v575_v58 = vpop.permute.xlu0 %574 }
 0x162   : > { %1243 = vmatpush3.bf16.msra.mxu1 %v1242_v55  ;;  %v583_v61 = vsel %vm306_vm1, %v577_v37, %v579_v57  ;;  %v582_v24 = vsel %vm306_vm1, %v575_v58, %v577_v37  ;;  %1236 = vmatpush1.bf16.msra.mxu0 %v1235_v22  ;;  %v598_v62 = vld [vmem:[#allocation4 + $0x38] sm:$0xff]  ;;  %v599_v10 = vld [vmem:[#allocation4 + $0x40] sm:$0xff]  ;;  %v780_v37 = vrot.slane %v1198_v19, %v1592_v3 }
 0x163   : > { %1244 = vmatprep.subr.bf16.mxu1 %v1432_v39  ;;  %589 = vst [vmem:[#allocation4 + $0x68] sm:$0xf] %v583_v61  ;;  %588 = vst [vmem:[#allocation4 + $0x60] sm:$0xf] %v582_v24  ;;  %v1237_v0 = vpack.c.bf16 %v601_v63, %v598_v62  ;;  %v283_v63 = vld [vmem:[%s1971_s4] sm:$0xf] }
 0x165   : > { %v581_v7 = vpop.permute.xlu1 %580  ;;  %1238 = vmatprep.subr.bf16.mxu0 %v1237_v0 }
 0x166   : > { %v584_v9 = vsel %vm306_vm1, %v579_v57, %v581_v7  ;;  %1240 = vmatpush1.bf16.msra.mxu0 %v1239_v6  ;;  %v602_v11 = vld [vmem:[#allocation4 + $0x58] sm:$0xff] }
 0x167   : > { %590 = vst [vmem:[#allocation4 + $0x70] sm:$0xf] %v584_v9  ;;  %v1245_v13 = vpack.c.bf16 %v602_v11, %v599_v10 }
 0x169   : > { %1246 = vmatpush3.bf16.msra.mxu1 %v1245_v13 }
 0x16a   : > { %v604_v39 = vld [vmem:[#allocation4 + $0x68] sm:$0xf]  ;;  %v603_v15 = vld [vmem:[#allocation4 + $0x60] sm:$0xf]  ;;  %1228 = vmatprep.subr.mxu1 %v1423_v1 }
 0x16b   : > { %1199 = vmatprep.subr.msk.mxu0 %vm308_vm3, %v604_v39 }
 0x16c   : > { %1200 = vmatpush1.msk.msra.mxu0 %vm308_vm3, %v603_v15 }
 0x16d   : > { %1201 = vmatmul.mubr.msk.f32.vlgmr.msra.gmra.mrb[0].mxu0 %vm611_vm10, %v280_v14 }
 0x16e   : > { %v605_v16 = vld [vmem:[#allocation4 + $0x70] sm:$0xf]  ;;  %1085 = vmatprep.mubr.f32.mxu0 %v1423_v1 }
 0x16f   : > { %1229 = vmatpush3.msk.msra.mxu1 %vm308_vm3, %v605_v16 }
 0x170   : > { %1231 = vmatmul.mubr.msk.f32.vlgmr.msra.gmra.mrb[0].mxu1 %vm611_vm10, %v280_v14 }
 0x172   : > { %v609_v20 = vpop.permute.xlu0 %608 }
 0x240   : > { %v690_v21 = vpop.f32.mrb[0].mxu0 }
 0x241   : > { %v692_v17 = vpop.f32.mrb[1].mxu0  ;;  %v691_v26 = vadd.f32 %v690_v21, %v609_v20 }
 0x242   : > { %v693_v28 = vadd.f32 %v692_v17, %v609_v20 }
 0x243   : > { %v765_v29 = vmax.f32 %v691_v26, 0.0  ;;  %v761_v35 = vpop.f32.mrb[0].mxu1 }
 0x244   : > { %v766_v1 = vmax.f32 %v693_v28, 0.0  ;;  %v762_v36 = vadd.f32 %v761_v35, %v609_v20  ;;  %v1232_v38 = vpop.f32.mrb[1].mxu1 }
 0x245   : > { %v784_v41 = vmul.f32 %v772_v23, %v765_v29 }
 0x246   : > { %v785_v42 = vmul.f32 %v776_v27, %v766_v1  ;;  %v767_v43 = vmax.f32 %v762_v36, 0.0 }
 0x247   : > { %v1323_v24 = vcombine.low %v784_v41, %v784_v41 }
 0x248   : > { %v789_v34 = vcombine.low %v784_v41, %v785_v42  ;;  %v786_v44 = vmul.f32 %v780_v37, %v767_v43  ;;  %v1322_v45 = vcombine.low %v785_v42, %v785_v42 }
 0x24a   : > { %791 = vst [vmem:[#allocation3 + $0x4] sm:$0xff] %v789_v34  ;;  %896 = vst [vmem:[#allocation4 + $0x30] sm:$0xf] %v789_v34 }
 0x24b   : > { %792 = vst [vmem:[#allocation3 + $0xc] sm:$0xf] %v786_v44  ;;  %897 = vst [vmem:[#allocation4 + $0x38] sm:$0xf] %v1322_v45 }
 0x251   : > { %v818_v5 = vld [vmem:[#allocation3] sm:$0xff] }
 0x252   : > { %v892_v4 = vld [vmem:[#allocation3 + $0xc] sm:$0xf]  ;;  %826 = vrot.lane.b32.xlu0 %v818_v5, %s1430_s17  ;;  %v868_v51 = vmul.f32 %v818_v5, %v1649_v33  ;;  %v901_v33 = vmul.f32 %v789_v34, %v1675_v52  ;;  %v822_v58 = vcombine.low %v818_v5, %v818_v5 }
 0x253   : > { %v1806_v46 = vld [vmem:[#allocation3 + $0xc] sm:$0xff]  ;;  %898 = vst [vmem:[#allocation4 + $0x40] sm:$0xf] %v892_v4 }
 0x254   : > { %v927_v3 = vmul.f32 %v1806_v46, %v1707_v18  ;;  %v954_v49 = vcombine.low %v1806_v46, %v1806_v46  ;;  %v902_v50 = vmul.f32 %v1806_v46, %v1720_v25  ;;  %v794_v55 = vld [vmem:[#allocation3 + $0x8] sm:$0xff]  ;;  %v795_v18 = vmul.f32 %v818_v5, %v1646_v32 }
 0x255   : > { %v796_v56 = vmul.f32 %v794_v55, %v1678_v53  ;;  %v843_v25 = vmul.f32 %v818_v5, %v1660_v40  ;;  %v823_v22 = vcombine.low %v794_v55, %v794_v55  ;;  %v844_v57 = vmul.f32 %v794_v55, %v1688_v60 }
 0x256   : > { %936 = vrot.lane.b32.xlu1 %v927_v3, %s1424_s7  ;;  %957 = vrot.lane.b32.xlu0 %v789_v34, %s1431_s29  ;;  %v906_v54 = vcombine.low %v902_v50, %v902_v50  ;;  %v926_v53 = vmul.f32 %v789_v34, %v1666_v48  ;;  %v799_v59 = vcombine.high %v795_v18, %v795_v18 }
 0x257   : > { %v847_v32 = vcombine.high %v843_v25, %v843_v25  ;;  %v869_v52 = vmul.f32 %v794_v55, %v1697_v8  ;;  %v905_v61 = vcombine.low %v901_v33, %v901_v33  ;;  %v872_v48 = vcombine.low %v868_v51, %v868_v51 }
 0x258   : > { %v930_v40 = vcombine.high %v926_v53, %v926_v53  ;;  %v975_v62 = vmul.f32 %v1806_v46, %v1755_v47  ;;  %v974_v8 = vmul.f32 %v789_v34, %v1733_v30  ;;  %v931_v47 = vcombine.high %v927_v3, %v927_v3 }
 0x259   : > { %v873_v60 = vcombine.low %v869_v52, %v869_v52  ;;  %v800_v30 = vcombine.high %v796_v56, %v796_v56  ;;  %v848_v6 = vcombine.high %v844_v57, %v844_v57 }
 0x25a   : > { %959 = vrot.lane.b32.xlu1 %v954_v49, %s1431_s29  ;;  %876 = vrot.lane.b32.xlu0 %v868_v51, %s1427_s11  ;;  %v978_v0 = vcombine.high %v974_v8, %v974_v8  ;;  %v979_v2 = vcombine.high %v975_v62, %v975_v62 }
 0x25e   : > { %911 = vrot.lane.b32.xlu1 %v906_v54, %s1425_s12  ;;  %801 = vrot.lane.b32.xlu0 %v795_v18, %s1429_s15 }
 0x262   : > { %805 = vrot.lane.b32.xlu1 %v796_v56, %s1429_s15  ;;  %849 = vrot.lane.b32.xlu0 %v843_v25, %s1428_s14 }
 0x266   : > { %828 = vrot.lane.b32.xlu1 %v823_v22, %s1430_s17  ;;  %909 = vrot.lane.b32.xlu0 %v901_v33, %s1425_s12 }
 0x26a   : > { %853 = vrot.lane.b32.xlu1 %v844_v57, %s1428_s14  ;;  %851 = vrot.lane.b32.xlu0 %v847_v32, %s1428_s14 }
 0x26e   : > { %824 = vrot.lane.b32.xlu1 %v822_v58, %s1430_s17  ;;  %934 = vrot.lane.b32.xlu0 %v930_v40, %s1424_s7 }
 0x272   : > { %803 = vrot.lane.b32.xlu1 %v799_v59, %s1429_s15  ;;  %907 = vrot.lane.b32.xlu0 %v905_v61, %s1425_s12 }
 0x276   : > { %878 = vrot.lane.b32.xlu1 %v873_v60, %s1427_s11  ;;  %955 = vrot.lane.b32.xlu0 %v1323_v24, %s1431_s29 }
 0x27a   : > { %874 = vrot.lane.b32.xlu1 %v872_v48, %s1427_s11  ;;  %984 = vrot.lane.b32.xlu0 %v975_v62, %s1426_s13 }
 0x27e   : > { %932 = vrot.lane.b32.xlu1 %v926_v53, %s1424_s7  ;;  %1009 = vperm.xlu0 %1313, %v283_v63  }
 0x282   : > { %982 = vrot.lane.b32.xlu1 %v978_v0, %s1426_s13  ;;  %830 = vrot.lane.b32.xlu0 %v794_v55, %s1430_s17  ;;  %v281_v0 = vld [vmem:[%s1970_s3] sm:$0xf] }
 0x286   : > { %980 = vrot.lane.b32.xlu1 %v974_v8, %s1426_s13  ;;  %880 = vrot.lane.b32.xlu0 %v869_v52, %s1427_s11  ;;  %s267_s11 = scalar_lea.vmem [#allocation8], %s1195_s28 }
 0x28a   : > { %913 = vrot.lane.b32.xlu1 %v902_v50, %s1425_s12  ;;  %938 = vrot.lane.b32.xlu0 %v931_v47, %s1424_s7 }
 0x28e   : > { %807 = vrot.lane.b32.xlu1 %v800_v30, %s1429_s15  ;;  %986 = vrot.lane.b32.xlu0 %v979_v2, %s1426_s13  ;;  %s1213_s13 = sshll.u32 %s1492_s25, 7  ;;  %s1435_s25 = smov [#allocation8]  }
 0x28f   : > { %s1358_s28 = sshll.u32 %s1435_s25, 4  ;;  %s1359_s28 = int_to_ptr.vmem [resolvable:$false] %s1358_s28 }
 0x290   : > { %s1360_s19 = scalar_lea.vmem %s1359_s28, 256 }
 0x292   : > { %855 = vrot.lane.b32.xlu1 %v848_v6, %s1428_s14  ;;  %s1118_s14 = sshll.u32 %s267_s11, 4  ;;  %s1925_s14 = int_to_ptr.vmem [resolvable:$true] %s1118_s14 }
 0x293   : > { %s1354_s20 = scalar_lea.vmem %s1925_s14, 128  ;;  %p1361_p7 = scmp.lt.s32.totalorder %s1925_s14, %s1359_s28 }
 0x294   : > { %p1355_p6 = scmp.ne.s32.totalorder %s1925_s14, %s1354_s20  ;;  %p1362_p10 = scmp.lt.s32.totalorder %s1360_s19, %s1354_s20 }
 0x296   : > { %961 = vrot.lane.b32.xlu1 %v1806_v46, %s1431_s29  ;;  %s1923_s29 = scalar_lea.hbm %s1973_s6, %s1213_s13  ;;  %p1356_p12 = pnand %p1355_p6, %p1982_p11 }
 0x297   : > { %p1363_p2 = por %p1362_p10, %p1361_p7 }
 0x298   : > { %p1357_p13 = pneg %p1356_p12 }
 0x29a   : > { %p1364_p4 = pnand %p1363_p2, %p1357_p13 }
 0x2c4   : > { %v827_v7 = vpop.permute.xlu0 %826 }
 0x2c8   : > { %v1861_v9 = vpop.permute.xlu1 %936  ;;  %v958_v10 = vpop.permute.xlu0 %957 }
 0x2cc   : > { %v1863_v11 = vpop.permute.xlu1 %959  ;;  %v877_v14 = vpop.permute.xlu0 %876 }
 0x2cd   : > { %v964_v13 = vsel %vm545_vm7, %v958_v10, %v1863_v11 }
 0x2ce   : > { %970 = vst [vmem:[#allocation4 + $0x50] sm:$0xf0] %v964_v13 }
 0x2d0   : > { %v1867_v39 = vpop.permute.xlu1 %911  ;;  %v802_v15 = vpop.permute.xlu0 %801 }
 0x2d4   : > { %v1869_v16 = vpop.permute.xlu1 %805  ;;  %v850_v19 = vpop.permute.xlu0 %849 }
 0x2d8   : > { %v1871_v20 = vpop.permute.xlu1 %828  ;;  %v910_v17 = vpop.permute.xlu0 %909 }
 0x2d9   : > { %v833_v21 = vsel %vm351_vm6, %v827_v7, %v1871_v20  ;;  %v916_v23 = vsel %vm421_vm0, %v910_v17, %v1867_v39 }
 0x2da   : > { %839 = vst [vmem:[#allocation4 + $0x8] sm:$0xf0] %v833_v21  ;;  %922 = vst [vmem:[#allocation4 + $0x38] sm:$0xf0] %v916_v23 }
 0x2dc   : > { %v1877_v26 = vpop.permute.xlu1 %853  ;;  %v852_v27 = vpop.permute.xlu0 %851 }
 0x2dd   : > { %v857_v28 = vsel %vm403_vm4, %v850_v19, %v852_v27  ;;  %v858_v29 = vsel %vm403_vm4, %v852_v27, %v1877_v26 }
 0x2de   : > { %863 = vst [vmem:[#allocation4 + $0x18] sm:$0xf] %v857_v28  ;;  %864 = vst [vmem:[#allocation4 + $0x20] sm:$0xf] %v858_v29 }
 0x2e0   : > { %v825_v35 = vpop.permute.xlu1 %824  ;;  %v935_v36 = vpop.permute.xlu0 %934 }
 0x2e1   : > { %v832_v1 = vsel %vm351_vm6, %v825_v35, %v827_v7  ;;  %v941_v37 = vsel %vm383_vm2, %v935_v36, %v1861_v9  ;;  %v1002_v53 = vld [vmem:[#allocation4 + $0x38] sm:$0xff] }
 0x2e2   : > { %838 = vst [vmem:[#allocation4] sm:$0xf0] %v832_v1  ;;  %947 = vst [vmem:[#allocation4 + $0x50] sm:$0xf] %v941_v37 }
 0x2e4   : > { %v804_v38 = vpop.permute.xlu1 %803  ;;  %v908_v43 = vpop.permute.xlu0 %907 }
 0x2e5   : > { %v809_v41 = vsel %vm327_vm8, %v802_v15, %v804_v38  ;;  %v810_v42 = vsel %vm327_vm8, %v804_v38, %v1869_v16  ;;  %v915_v34 = vsel %vm421_vm0, %v908_v43, %v910_v17 }
 0x2e6   : > { %815 = vst [vmem:[#allocation4] sm:$0xf] %v809_v41  ;;  %816 = vst [vmem:[#allocation4 + $0x8] sm:$0xf] %v810_v42 }
 0x2e7   : > { %921 = vst [vmem:[#allocation4 + $0x30] sm:$0xf0] %v915_v34 }
 0x2e8   : > { %v879_v44 = vpop.permute.xlu1 %878  ;;  %v956_v4 = vpop.permute.xlu0 %955 }
 0x2e9   : > { %v883_v45 = vsel %vm441_vm5, %v877_v14, %v879_v44  ;;  %v963_v5 = vsel %vm545_vm7, %v956_v4, %v958_v10  ;;  %v1004_v25 = vld [vmem:[#allocation4 + $0x50] sm:$0xff] }
 0x2ea   : > { %889 = vst [vmem:[#allocation4 + $0x20] sm:$0xf0] %v883_v45  ;;  %969 = vst [vmem:[#allocation4 + $0x48] sm:$0xf0] %v963_v5  ;;  %v1251_v58 = vpack.c.bf16 %v1004_v25, %v1002_v53 }
 0x2ec   : > { %v875_v46 = vpop.permute.xlu1 %874  ;;  %v985_v18 = vpop.permute.xlu0 %984 }
 0x2ed   : > { %v882_v3 = vsel %vm441_vm5, %v875_v46, %v877_v14  ;;  %v998_v51 = vld [vmem:[#allocation4 + $0x8] sm:$0xff]  ;;  %v997_v33 = vld [vmem:[#allocation4] sm:$0xff] }
 0x2ee   : > { %888 = vst [vmem:[#allocation4 + $0x18] sm:$0xf0] %v882_v3  ;;  %v1001_v52 = vld [vmem:[#allocation4 + $0x30] sm:$0xff] }
 0x2f0   : > { %v933_v49 = vpop.permute.xlu1 %932 }
 0x2f1   : > { %v940_v50 = vsel %vm383_vm2, %v933_v49, %v935_v36  ;;  %v1000_v54 = vld [vmem:[#allocation4 + $0x20] sm:$0xff] }
 0x2f2   : > { %946 = vst [vmem:[#allocation4 + $0x48] sm:$0xf] %v940_v50  ;;  %v1247_v55 = vpack.c.bf16 %v1000_v54, %v998_v51 }
 0x2f4   : > { %1248 = vmatprep.subr.bf16.mxu0 %v1247_v55  ;;  %v983_v56 = vpop.permute.xlu1 %982 }
 0x2f5   : > { %v989_v22 = vsel %vm306_vm1, %v983_v56, %v985_v18  ;;  %v999_v57 = vld [vmem:[#allocation4 + $0x18] sm:$0xff] }
 0x2f6   : > { %995 = vst [vmem:[#allocation4 + $0x68] sm:$0xf] %v989_v22  ;;  %v1249_v32 = vpack.c.bf16 %v999_v57, %v997_v33 }
 0x2f8   : > { %1250 = vmatpush1.bf16.msra.mxu0 %v1249_v32  ;;  %v981_v40 = vpop.permute.xlu1 %980 }
 0x2f9   : > { %v988_v59 = vsel %vm306_vm1, %v981_v40, %v983_v56  ;;  %1252 = vmatprep.subr.bf16.mxu0 %v1251_v58  ;;  %v1003_v61 = vld [vmem:[#allocation4 + $0x48] sm:$0xff] }
 0x2fa   : > { %994 = vst [vmem:[#allocation4 + $0x60] sm:$0xf] %v988_v59  ;;  %v1253_v60 = vpack.c.bf16 %v1003_v61, %v1001_v52 }
 0x2fc   : > { %1254 = vmatpush1.bf16.msra.mxu0 %v1253_v60  ;;  %v914_v24 = vpop.permute.xlu1 %913 }
 0x2fd   : > { %v917_v48 = vsel %vm421_vm0, %v1867_v39, %v914_v24  ;;  %v1006_v62 = vld [vmem:[#allocation4 + $0x68] sm:$0xf]  ;;  %v1010_v8 = vpop.permute.xlu0 %1009 }
 0x2fe   : > { %923 = vst [vmem:[#allocation4 + $0x40] sm:$0xf0] %v917_v48  ;;  %1204 = vmatprep.subr.msk.mxu0 %vm308_vm3, %v1006_v62 }
 0x300   : > { %v808_v63 = vpop.permute.xlu1 %807 }
 0x301   : > { %v811_v47 = vsel %vm327_vm8, %v1869_v16, %v808_v63  ;;  %v1005_v30 = vld [vmem:[#allocation4 + $0x60] sm:$0xf]  ;;  %v831_v2 = vpop.permute.xlu0 %830 }
 0x302   : > { %817 = vst [vmem:[#allocation4 + $0x10] sm:$0xf] %v811_v47  ;;  %1205 = vmatpush1.msk.msra.mxu0 %vm308_vm3, %v1005_v30  ;;  %v834_v6 = vsel %vm351_vm6, %v1871_v20, %v831_v2 }
 0x303   : > { %1206 = vmatmul.mubr.msk.f32.vlgmr.msra.gmra.mrb[2].mxu0 %vm611_vm10, %v281_v0  ;;  %840 = vst [vmem:[#allocation4 + $0x10] sm:$0xf0] %v834_v6 }
 0x304   : > { %v856_v7 = vpop.permute.xlu1 %855 }
 0x305   : > { %v859_v10 = vsel %vm403_vm4, %v1877_v26, %v856_v7  ;;  %v881_v13 = vpop.permute.xlu0 %880 }
 0x306   : > { %865 = vst [vmem:[#allocation4 + $0x28] sm:$0xf] %v859_v10  ;;  %v884_v14 = vsel %vm441_vm5, %v879_v44, %v881_v13 }
 0x307   : > { %890 = vst [vmem:[#allocation4 + $0x28] sm:$0xf0] %v884_v14 }
 0x308   : > { %v962_v39 = vpop.permute.xlu1 %961 }
 0x309   : > { %v965_v15 = vsel %vm545_vm7, %v1863_v11, %v962_v39  ;;  %v939_v16 = vpop.permute.xlu0 %938 }
 0x30a   : > { %971 = vst [vmem:[#allocation4 + $0x58] sm:$0xf0] %v965_v15  ;;  %v942_v19 = vsel %vm383_vm2, %v1861_v9, %v939_v16 }
 0x30b   : > { %948 = vst [vmem:[#allocation4 + $0x58] sm:$0xf] %v942_v19 }
 0x30d   : > { %v987_v20 = vpop.permute.xlu0 %986 }
 0x30e   : > { %v990_v21 = vsel %vm306_vm1, %v985_v18, %v987_v20 }
 0x30f   : > { %996 = vst [vmem:[#allocation4 + $0x70] sm:$0xf] %v990_v21 }
 0x3d6   : > { %v1087_v17 = vpop.f32.mrb[2].mxu0 }
 0x3d7   : > { %v1088_v23 = vadd.f32 %v1087_v17, %v1010_v8  ;;  %v1089_v26 = vpop.f32.mrb[3].mxu0 }
 0x3d8   : > { %v1090_v27 = vadd.f32 %v1089_v26, %v1010_v8 }
 0x3d9   : > { %v1096_v28 = vadd.f32 %v1088_v23, %v1608_v12 }
 0x3da   : > { %v1097_v11 = vadd.f32 %v1090_v27, %v1737_v31 }
 0x3dc   : > { %v1100_v9 = vcombine.low %v1096_v28, %v1097_v11 }
 0x3de   : > { %1102 = vst [vmem:[%s267_s11] sm:$0xff] %v1100_v9 }
 0x3df   : > { %1367 = shalt.err (!%p1364_p4)
}
 0x3e0   : > { %s1368_s26 = scalar_lea.hbm %s1923_s29, 128  ;;  %s1372_s7 = scalar_lea.hbm %s1973_s6, 256 }
 0x3e1   : > { %p1369_p5 = scmp.ne.s32.totalorder %s1923_s29, %s1368_s26  ;;  %p1373_p0 = scmp.lt.u32.totalorder %s1923_s29, %s1973_s6 }
 0x3e2   : > { %p1374_p1 = scmp.lt.u32.totalorder %s1372_s7, %s1368_s26  ;;  %p1376_p6 = scmp.lt.u32.totalorder %s1368_s26, %s1923_s29 }
 0x3e3   : > { %p1370_p8 = pnand %p1369_p5, %p1982_p11 }
 0x3e4   : > { %p1375_p3 = por %p1374_p1, %p1373_p0 }
 0x3e5   : > { %p1371_p9 = pneg %p1370_p8 }
 0x3e6   : > { %p1377_p12 = por %p1376_p6, %p1375_p3 }
 0x3e8   : > { %p1378_p13 = pnand %p1377_p12, %p1371_p9 }
 0x3ea   : > { %1381 = shalt.err (!%p1378_p13)
}
 0x3eb   : > { %1257 = dma.vmem_to_hbm [thread:$0]  (%p1982_p11), %s1925_s14, 128, %s1923_s29, %s1104_s18  }
 0x3ec PF: > { %s1130_s11 = sand.u32 1, %s1408_s21   ;;  %p1983_p7 = scmp.ne.s32.totalorder %s1978_s10, 0 }
 0x3ed   : > { %p1984_p10 = scmp.ge.s32.totalorder %s1420_s24, 2  ;;  %s1131_s15 = scalar_lea.sflag [#allocation7], %s1130_s11 }
 0x3ef   : > { %p1264_p2 = pnand %p1984_p10, %p1983_p7 }
 0x3f1   : > { %1403 = dma.done.wait (!%p1264_p2), %s1131_s15, 128  }
 0x3f2   : > { %1405 = vsyncadd (!%p1264_p2), %s1131_s15, 4294967168  ;;  %p19_p4 = scmp.ge.s32.totalorder %s1496_s27, 4   ;;  %s1985_s21 = smov %s1412_s22 }
 0x3f3   : > { %s1986_s22 = smov %s1416_s23  ;;  %s1987_s23 = smov %s1508_s30 }
 0x3f4   : > { %s1988_s24 = smov %s1496_s27  ;;  %21 = sbr.rel (!%p19_p4) target bundleno = 5 (0x5), region = 91 }
 0x3fb   :  { %1136 = vsyncpa [#allocation6], 1 }
 0x3fc   :  { %1138 = vsyncpa [#allocation6 + $0x1], 1 }
 0x3fd   :  { %1139 = vsyncpa [#allocation7], 1 }
 0x3fe   :  { %1141 = vsyncpa [#allocation7 + $0x1], 1 }

</bundles_post_ra>
